<compile_context>
chip_gen: v6e
topology: v6e:2x2x1
jax: 0.10.0
libtpu: 0.0.40
codegen_flags: <defaults>
</compile_context>

<pallas_src>
import functools

import jax
import jax.numpy as jnp
from jax import lax
from jax.experimental import pallas as pl
from jax.experimental.pallas import tpu as pltpu


OUT_LANES = 128  # lane-dense padded width for the 2-channel offset output


def _reg_head_kernel(x_ref, mask_ref, w1_ref, b1_ref, w2_ref, b2_ref,
                     w3_ref, b3_ref, scale_ref, out_ref, *, t_per_seq):
    """One FPN level per grid step; whole batch in one block.

    x_ref:     (1, N, Cin)  with N = B * t_per_seq (batch flattened into rows)
    mask_ref:  (1, N, 1)
    w*_ref:    (3*Cin, Cout) stacked-tap weights (tap order: t-1, t, t+1)
    b*_ref:    (1, Cout)
    scale_ref: (L,) f32 in SMEM (per-level Scale parameter)
    out_ref:   (1, N, OUT_LANES)  (only the first 2 lanes are real channels)
    """
    lvl = pl.program_id(0)
    x = x_ref[0].astype(jnp.float32)       # (N, Cin)
    m = mask_ref[0].astype(jnp.float32)    # (N, 1)
    n_rows = x.shape[0]

    # Within-sequence position of each row; zeroes the circular wrap of the
    # rolls at sequence starts/ends (and batch boundaries) -> zero-padded
    # 'same' conv semantics, identical to MaskedConv1D(padding=1).
    r = lax.broadcasted_iota(jnp.int32, (n_rows, 1), 0)
    t = r % t_per_seq
    not_first = (t > 0).astype(jnp.float32)
    not_last = (t < (t_per_seq - 1)).astype(jnp.float32)

    def conv3(h, w_ref, b_ref):
        # k=3 'same' conv == one matmul over the stacked taps [h[t-1], h, h[t+1]].
        h_prev = pltpu.roll(h, 1, axis=0) * not_first           # h[t-1], zero at t=0
        h_next = pltpu.roll(h, n_rows - 1, axis=0) * not_last   # h[t+1], zero at t=T-1
        h3 = jnp.concatenate([h_prev, h, h_next], axis=-1)      # (N, 3*Cin)
        return jnp.dot(h3, w_ref[...],
                       preferred_element_type=jnp.float32) + b_ref[...]

    # head[0]: MaskedConv1D -> Identity (with_ln=False) -> ReLU
    h = jnp.maximum(conv3(x, w1_ref, b1_ref) * m, 0.0)
    # head[1]: MaskedConv1D -> Identity -> ReLU
    h = jnp.maximum(conv3(h, w2_ref, b2_ref) * m, 0.0)
    # offset_head: MaskedConv1D, then per-level Scale, then ReLU
    o = conv3(h, w3_ref, b3_ref) * m
    out_ref[0] = jnp.maximum(o * scale_ref[lvl], 0.0).astype(out_ref.dtype)


def pt_transformer_reg_head_forward(fpn_feats, fpn_masks, params):
    """fpn_feats[l]: (B, T_l, Cin); fpn_masks[l]: (B, T_l, 1); returns tuple of (B, T_l, 2)."""
    assert len(fpn_feats) == len(fpn_masks)
    L = len(fpn_feats)
    B, _, Cin = fpn_feats[0].shape
    feat_dim = params["w1"].shape[-1]
    Ts = [int(f.shape[1]) for f in fpn_feats]
    t_pad = max(8, ((max(Ts) + 7) // 8) * 8)   # common padded length, sublane aligned
    N = B * t_pad

    # Stack all FPN levels (zero-padded to t_pad) and flatten batch into rows.
    feats = jnp.stack([
        jnp.pad(f, ((0, 0), (0, t_pad - f.shape[1]), (0, 0))).reshape(N, Cin)
        for f in fpn_feats])                                           # (L, N, Cin)
    masks = jnp.stack([
        jnp.pad(mk.astype(jnp.float32),
                ((0, 0), (0, t_pad - mk.shape[1]), (0, 0))).reshape(N, 1)
        for mk in fpn_masks])                                          # (L, N, 1)

    # Stacked-tap weights; pad the 2-wide offset head to OUT_LANES lanes.
    w1f = params["w1"].reshape(3 * Cin, feat_dim)
    w2f = params["w2"].reshape(3 * feat_dim, feat_dim)
    w3f = jnp.pad(params["w3"],
                  ((0, 0), (0, 0), (0, OUT_LANES - params["w3"].shape[-1])))
    w3f = w3f.reshape(3 * feat_dim, OUT_LANES)
    b1 = params["b1"]
    b2 = params["b2"]
    b3 = jnp.pad(params["b3"], ((0, 0), (0, OUT_LANES - params["b3"].shape[-1])))
    scales = jnp.concatenate(
        [jnp.reshape(s, (1,)) for s in params["scales"]]).astype(jnp.float32)   # (L,)

    def full(shp):
        return pl.BlockSpec(shp, lambda l: (0,) * len(shp))

    # TODO(synk): at production sizes (feat_dim~512, T~1k-2k) cast activations/weights
    # to bf16 (f32 accumulate) and tile T with a 1-row halo instead of whole-T blocks.
    out = pl.pallas_call(
        functools.partial(_reg_head_kernel, t_per_seq=t_pad),
        out_shape=jax.ShapeDtypeStruct((L, N, OUT_LANES), fpn_feats[0].dtype),
        grid=(L,),
        in_specs=[
            pl.BlockSpec((1, N, Cin), lambda l: (l, 0, 0)),
            pl.BlockSpec((1, N, 1), lambda l: (l, 0, 0)),
            full(w1f.shape), full(b1.shape),
            full(w2f.shape), full(b2.shape),
            full(w3f.shape), full(b3.shape),
            pl.BlockSpec(memory_space=pltpu.MemorySpace.SMEM),
        ],
        out_specs=pl.BlockSpec((1, N, OUT_LANES), lambda l: (l, 0, 0)),
        compiler_params=pltpu.CompilerParams(dimension_semantics=("parallel",)),
    )(feats, masks, w1f, b1, w2f, b2, w3f, b3, scales)

    out = out.reshape(L, B, t_pad, OUT_LANES)
    return tuple(out[l, :, :Ts[l], :2] for l in range(L))


# ---------------- pure-JAX reference (for correctness check) ----------------
def _ref_conv_same(x, w, b):
    xp = jnp.pad(x, ((0, 0), (1, 1), (0, 0)))
    hp = "highest"
    return (jnp.einsum("btc,cf->btf", xp[:, :-2], w[0], precision=hp)
            + jnp.einsum("btc,cf->btf", xp[:, 1:-1], w[1], precision=hp)
            + jnp.einsum("btc,cf->btf", xp[:, 2:], w[2], precision=hp)
            + b)


def ref_forward(fpn_feats, fpn_masks, params):
    outs = tuple()
    for l, (x, m) in enumerate(zip(fpn_feats, fpn_masks)):
        h = jnp.maximum(_ref_conv_same(x, params["w1"], params["b1"]) * m, 0.0)
        h = jnp.maximum(_ref_conv_same(h, params["w2"], params["b2"]) * m, 0.0)
        o = _ref_conv_same(h, params["w3"], params["b3"]) * m
        outs += (jnp.maximum(o * params["scales"][l][0, 0], 0.0),)
    return outs


if __name__ == "__main__":
    key = jax.random.PRNGKey(0)
    B = 2
    input_dim = 32
    feat_dim = 32
    fpn_levels = 2
    Ts = [16, 8]                     # sequence length per FPN level

    keys = jax.random.split(key, 16)
    # num_layers=3 -> 2 shared head convs + 1 offset conv (kernel_size=3, bias=True)
    w1 = jax.random.normal(keys[0], (3, input_dim, feat_dim), jnp.float32) * 0.1
    b1 = jax.random.normal(keys[1], (1, feat_dim), jnp.float32) * 0.05
    w2 = jax.random.normal(keys[2], (3, feat_dim, feat_dim), jnp.float32) * 0.1
    b2 = jax.random.normal(keys[3], (1, feat_dim), jnp.float32) * 0.05
    w3 = jax.random.normal(keys[4], (3, feat_dim, 2), jnp.float32) * 0.1
    b3 = jax.random.normal(keys[5], (1, 2), jnp.float32) * 0.05
    scales = [jnp.array([[1.0 + 0.25 * l]], dtype=jnp.float32)
              for l in range(fpn_levels)]
    params = dict(w1=w1, b1=b1, w2=w2, b2=b2, w3=w3, b3=b3, scales=scales)

    fpn_feats, fpn_masks = [], []
    valid_lens = [[16, 11], [8, 6]]   # per-level, per-batch valid lengths
    for l, T in enumerate(Ts):
        fpn_feats.append(jax.random.normal(keys[6 + l], (B, T, input_dim), jnp.float32))
        t_idx = jnp.arange(T)[None, :, None]
        lens = jnp.array(valid_lens[l], dtype=jnp.int32)[:, None, None]
        fpn_masks.append((t_idx < lens).astype(jnp.float32))

    outs = pt_transformer_reg_head_forward(fpn_feats, fpn_masks, params)
    outs = jax.block_until_ready(outs)

    refs = ref_forward(fpn_feats, fpn_masks, params)
    for o, r in zip(outs, refs):
        assert o.shape == r.shape, (o.shape, r.shape)
        if not jnp.allclose(o, r, atol=2e-2, rtol=2e-2):
            raise AssertionError("Pallas output mismatch vs reference")

    print("KERNEL_OK")
</pallas_src>

<mosaic_0001>
module attributes {stable_mosaic.version = 11 : i64} {
  func.func @_reg_head_kernel(%arg0: i32, %arg1: memref<1x32x32xf32, #tpu.memory_space<vmem>>, %arg2: memref<1x32x1xf32, #tpu.memory_space<vmem>>, %arg3: memref<96x32xf32, #tpu.memory_space<vmem>>, %arg4: memref<1x32xf32, #tpu.memory_space<vmem>>, %arg5: memref<96x32xf32, #tpu.memory_space<vmem>>, %arg6: memref<1x32xf32, #tpu.memory_space<vmem>>, %arg7: memref<96x128xf32, #tpu.memory_space<vmem>>, %arg8: memref<1x128xf32, #tpu.memory_space<vmem>>, %arg9: memref<2xf32, #tpu.memory_space<smem>>, %arg10: memref<1x32x128xf32, #tpu.memory_space<vmem>>) attributes {dimension_semantics = [#tpu.dimension_semantics<parallel>], iteration_bounds = array<i64: 2>, scalar_prefetch = 0 : i64, scratch_operands = 0 : i64, tpu.core_type = #tpu.core_type<tc>, window_params = [{transform_indices = @transform_0, window_bounds = array<i64: 1, 32, 32>}, {transform_indices = @transform_1, window_bounds = array<i64: 1, 32, 1>}, {pipeline_mode = #tpu.pipeline_mode<synchronous>, transform_indices = @transform_2, window_bounds = array<i64: 96, 32>}, {pipeline_mode = #tpu.pipeline_mode<synchronous>, transform_indices = @transform_3, window_bounds = array<i64: 1, 32>}, {pipeline_mode = #tpu.pipeline_mode<synchronous>, transform_indices = @transform_4, window_bounds = array<i64: 96, 32>}, {pipeline_mode = #tpu.pipeline_mode<synchronous>, transform_indices = @transform_5, window_bounds = array<i64: 1, 32>}, {pipeline_mode = #tpu.pipeline_mode<synchronous>, transform_indices = @transform_6, window_bounds = array<i64: 96, 128>}, {pipeline_mode = #tpu.pipeline_mode<synchronous>, transform_indices = @transform_7, window_bounds = array<i64: 1, 128>}, {transform_indices = @transform_8, window_bounds = array<i64: 2>}, {transform_indices = @transform_9, window_bounds = array<i64: 1, 32, 128>}]} {
    %c0 = arith.constant 0 : index
    %c0_0 = arith.constant 0 : index
    %c0_1 = arith.constant 0 : index
    %0 = vector.load %arg1[%c0, %c0_0, %c0_1] : memref<1x32x32xf32, #tpu.memory_space<vmem>>, vector<1x32x32xf32>
    %1 = vector.shape_cast %0 : vector<1x32x32xf32> to vector<32x32xf32>
    %c0_2 = arith.constant 0 : index
    %c0_3 = arith.constant 0 : index
    %c0_4 = arith.constant 0 : index
    %2 = vector.load %arg2[%c0_2, %c0_3, %c0_4] : memref<1x32x1xf32, #tpu.memory_space<vmem>>, vector<1x32x1xf32>
    %3 = vector.shape_cast %2 : vector<1x32x1xf32> to vector<32x1xf32>
    %4 = tpu.iota {dimensions = array<i32: 0>} : vector<32x1xi32>
    %c16_i32 = arith.constant 16 : i32
    %c0_i32 = arith.constant 0 : i32
    %5 = arith.cmpi eq, %c16_i32, %c0_i32 : i32
    %c1_i32 = arith.constant 1 : i32
    %6 = arith.select %5, %c1_i32, %c16_i32 : i32
    %7 = vector.broadcast %6 : i32 to vector<32x1xi32>
    %8 = arith.remsi %4, %7 : vector<32x1xi32>
    %c0_i32_5 = arith.constant 0 : i32
    %9 = vector.broadcast %c0_i32_5 : i32 to vector<32x1xi32>
    %10 = arith.cmpi ne, %8, %9 : vector<32x1xi32>
    %c0_i32_6 = arith.constant 0 : i32
    %11 = vector.broadcast %c0_i32_6 : i32 to vector<32x1xi32>
    %12 = arith.cmpi slt, %8, %11 : vector<32x1xi32>
    %c0_i32_7 = arith.constant 0 : i32
    %13 = arith.cmpi slt, %6, %c0_i32_7 : i32
    %14 = vector.broadcast %13 : i1 to vector<32x1xi1>
    %15 = vector.broadcast %14 : vector<32x1xi1> to vector<32x1xi1>
    %16 = arith.xori %12, %15 : vector<32x1xi1>
    %17 = arith.andi %16, %10 : vector<32x1xi1>
    %18 = vector.broadcast %6 : i32 to vector<32x1xi32>
    %19 = arith.addi %8, %18 : vector<32x1xi32>
    %20 = arith.select %17, %19, %8 : vector<32x1xi1>, vector<32x1xi32>
    %c0_i32_8 = arith.constant 0 : i32
    %21 = vector.broadcast %c0_i32_8 : i32 to vector<32x1xi32>
    %22 = arith.cmpi sgt, %20, %21 : vector<32x1xi32>
    %23 = arith.extui %22 : vector<32x1xi1> to vector<32x1xi32>
    %24 = arith.sitofp %23 : vector<32x1xi32> to vector<32x1xf32>
    %c15_i32 = arith.constant 15 : i32
    %25 = vector.broadcast %c15_i32 : i32 to vector<32x1xi32>
    %26 = arith.cmpi slt, %20, %25 : vector<32x1xi32>
    %27 = arith.extui %26 : vector<32x1xi1> to vector<32x1xi32>
    %28 = arith.sitofp %27 : vector<32x1xi32> to vector<32x1xf32>
    %c1_i32_9 = arith.constant 1 : i32
    %29 = tpu.dynamic_rotate %1 by %c1_i32_9 dim 0 : vector<32x32xf32>, i32 -> vector<32x32xf32>
    %30 = vector.broadcast %24 : vector<32x1xf32> to vector<32x32xf32>
    %31 = arith.mulf %29, %30 : vector<32x32xf32>
    %c31_i32 = arith.constant 31 : i32
    %32 = tpu.dynamic_rotate %1 by %c31_i32 dim 0 : vector<32x32xf32>, i32 -> vector<32x32xf32>
    %33 = vector.broadcast %28 : vector<32x1xf32> to vector<32x32xf32>
    %34 = arith.mulf %32, %33 : vector<32x32xf32>
    %35 = tpu.concatenate %31, %1, %34 in 1 : vector<32x32xf32>, vector<32x32xf32>, vector<32x32xf32> -> vector<32x96xf32>
    %c0_10 = arith.constant 0 : index
    %c0_11 = arith.constant 0 : index
    %36 = vector.load %arg3[%c0_10, %c0_11] : memref<96x32xf32, #tpu.memory_space<vmem>>, vector<96x32xf32>
    %cst = arith.constant dense<0.000000e+00> : vector<32x32xf32>
    %37 = tpu.matmul %35, %36, %cst {dimension_numbers = #tpu.dot_dimension_numbers<[1], [0], [0], [1], [0, 0, 1, 1], [], []>} : vector<32x96xf32>, vector<96x32xf32>, vector<32x32xf32> -> vector<32x32xf32>
    %c0_12 = arith.constant 0 : index
    %c0_13 = arith.constant 0 : index
    %38 = vector.load %arg4[%c0_12, %c0_13] : memref<1x32xf32, #tpu.memory_space<vmem>>, vector<1x32xf32>
    %39 = vector.broadcast %38 : vector<1x32xf32> to vector<32x32xf32>
    %40 = arith.addf %37, %39 : vector<32x32xf32>
    %41 = vector.broadcast %3 : vector<32x1xf32> to vector<32x32xf32>
    %42 = arith.mulf %40, %41 : vector<32x32xf32>
    %cst_14 = arith.constant 0.000000e+00 : f32
    %43 = vector.broadcast %cst_14 : f32 to vector<32x32xf32>
    %44 = arith.maximumf %42, %43 : vector<32x32xf32>
    %c1_i32_15 = arith.constant 1 : i32
    %45 = tpu.dynamic_rotate %44 by %c1_i32_15 dim 0 : vector<32x32xf32>, i32 -> vector<32x32xf32>
    %46 = vector.broadcast %24 : vector<32x1xf32> to vector<32x32xf32>
    %47 = arith.mulf %45, %46 : vector<32x32xf32>
    %c31_i32_16 = arith.constant 31 : i32
    %48 = tpu.dynamic_rotate %44 by %c31_i32_16 dim 0 : vector<32x32xf32>, i32 -> vector<32x32xf32>
    %49 = vector.broadcast %28 : vector<32x1xf32> to vector<32x32xf32>
    %50 = arith.mulf %48, %49 : vector<32x32xf32>
    %51 = tpu.concatenate %47, %44, %50 in 1 : vector<32x32xf32>, vector<32x32xf32>, vector<32x32xf32> -> vector<32x96xf32>
    %c0_17 = arith.constant 0 : index
    %c0_18 = arith.constant 0 : index
    %52 = vector.load %arg5[%c0_17, %c0_18] : memref<96x32xf32, #tpu.memory_space<vmem>>, vector<96x32xf32>
    %cst_19 = arith.constant dense<0.000000e+00> : vector<32x32xf32>
    %53 = tpu.matmul %51, %52, %cst_19 {dimension_numbers = #tpu.dot_dimension_numbers<[1], [0], [0], [1], [0, 0, 1, 1], [], []>} : vector<32x96xf32>, vector<96x32xf32>, vector<32x32xf32> -> vector<32x32xf32>
    %c0_20 = arith.constant 0 : index
    %c0_21 = arith.constant 0 : index
    %54 = vector.load %arg6[%c0_20, %c0_21] : memref<1x32xf32, #tpu.memory_space<vmem>>, vector<1x32xf32>
    %55 = vector.broadcast %54 : vector<1x32xf32> to vector<32x32xf32>
    %56 = arith.addf %53, %55 : vector<32x32xf32>
    %57 = vector.broadcast %3 : vector<32x1xf32> to vector<32x32xf32>
    %58 = arith.mulf %56, %57 : vector<32x32xf32>
    %cst_22 = arith.constant 0.000000e+00 : f32
    %59 = vector.broadcast %cst_22 : f32 to vector<32x32xf32>
    %60 = arith.maximumf %58, %59 : vector<32x32xf32>
    %c1_i32_23 = arith.constant 1 : i32
    %61 = tpu.dynamic_rotate %60 by %c1_i32_23 dim 0 : vector<32x32xf32>, i32 -> vector<32x32xf32>
    %62 = vector.broadcast %24 : vector<32x1xf32> to vector<32x32xf32>
    %63 = arith.mulf %61, %62 : vector<32x32xf32>
    %c31_i32_24 = arith.constant 31 : i32
    %64 = tpu.dynamic_rotate %60 by %c31_i32_24 dim 0 : vector<32x32xf32>, i32 -> vector<32x32xf32>
    %65 = vector.broadcast %28 : vector<32x1xf32> to vector<32x32xf32>
    %66 = arith.mulf %64, %65 : vector<32x32xf32>
    %67 = tpu.concatenate %63, %60, %66 in 1 : vector<32x32xf32>, vector<32x32xf32>, vector<32x32xf32> -> vector<32x96xf32>
    %c0_25 = arith.constant 0 : index
    %c0_26 = arith.constant 0 : index
    %68 = vector.load %arg7[%c0_25, %c0_26] : memref<96x128xf32, #tpu.memory_space<vmem>>, vector<96x128xf32>
    %cst_27 = arith.constant dense<0.000000e+00> : vector<32x128xf32>
    %69 = tpu.matmul %67, %68, %cst_27 {dimension_numbers = #tpu.dot_dimension_numbers<[1], [0], [0], [1], [0, 0, 1, 1], [], []>} : vector<32x96xf32>, vector<96x128xf32>, vector<32x128xf32> -> vector<32x128xf32>
    %c0_28 = arith.constant 0 : index
    %c0_29 = arith.constant 0 : index
    %70 = vector.load %arg8[%c0_28, %c0_29] : memref<1x128xf32, #tpu.memory_space<vmem>>, vector<1x128xf32>
    %71 = vector.broadcast %70 : vector<1x128xf32> to vector<32x128xf32>
    %72 = arith.addf %69, %71 : vector<32x128xf32>
    %73 = vector.broadcast %3 : vector<32x1xf32> to vector<32x128xf32>
    %74 = arith.mulf %72, %73 : vector<32x128xf32>
    %75 = arith.index_cast %arg0 : i32 to index
    %76 = memref.load %arg9[%75] : memref<2xf32, #tpu.memory_space<smem>>
    %77 = vector.broadcast %76 : f32 to vector<32x128xf32>
    %78 = arith.mulf %74, %77 : vector<32x128xf32>
    %cst_30 = arith.constant 0.000000e+00 : f32
    %79 = vector.broadcast %cst_30 : f32 to vector<32x128xf32>
    %80 = arith.maximumf %78, %79 : vector<32x128xf32>
    %c0_31 = arith.constant 0 : index
    %c0_32 = arith.constant 0 : index
    %c0_33 = arith.constant 0 : index
    %81 = vector.load %arg10[%c0_31, %c0_32, %c0_33] : memref<1x32x128xf32, #tpu.memory_space<vmem>>, vector<1x32x128xf32>
    %82 = vector.shape_cast %81 : vector<1x32x128xf32> to vector<32x128xf32>
    %83 = vector.shape_cast %80 : vector<32x128xf32> to vector<1x32x128xf32>
    tpu.vector_store %arg10[%c0_31, %c0_32, %c0_33], %83 {strides = array<i32>} : memref<1x32x128xf32, #tpu.memory_space<vmem>>, vector<1x32x128xf32>,
    return
  }
  func.func @transform_0(%arg0: i32) -> (i32, i32, i32) {
    %c0_i32 = arith.constant 0 : i32
    %c0_i32_0 = arith.constant 0 : i32
    %c0_i32_1 = arith.constant 0 : i32
    return %arg0, %c0_i32, %c0_i32_0 : i32, i32, i32
  }
  func.func @transform_1(%arg0: i32) -> (i32, i32, i32) {
    %c0_i32 = arith.constant 0 : i32
    %c0_i32_0 = arith.constant 0 : i32
    %c0_i32_1 = arith.constant 0 : i32
    return %arg0, %c0_i32, %c0_i32_0 : i32, i32, i32
  }
  func.func @transform_2(%arg0: i32) -> (i32, i32) {
    %c0_i32 = arith.constant 0 : i32
    %c0_i32_0 = arith.constant 0 : i32
    %c0_i32_1 = arith.constant 0 : i32
    return %c0_i32, %c0_i32_0 : i32, i32
  }
  func.func @transform_3(%arg0: i32) -> (i32, i32) {
    %c0_i32 = arith.constant 0 : i32
    %c0_i32_0 = arith.constant 0 : i32
    %c0_i32_1 = arith.constant 0 : i32
    return %c0_i32, %c0_i32_0 : i32, i32
  }
  func.func @transform_4(%arg0: i32) -> (i32, i32) {
    %c0_i32 = arith.constant 0 : i32
    %c0_i32_0 = arith.constant 0 : i32
    %c0_i32_1 = arith.constant 0 : i32
    return %c0_i32, %c0_i32_0 : i32, i32
  }
  func.func @transform_5(%arg0: i32) -> (i32, i32) {
    %c0_i32 = arith.constant 0 : i32
    %c0_i32_0 = arith.constant 0 : i32
    %c0_i32_1 = arith.constant 0 : i32
    return %c0_i32, %c0_i32_0 : i32, i32
  }
  func.func @transform_6(%arg0: i32) -> (i32, i32) {
    %c0_i32 = arith.constant 0 : i32
    %c0_i32_0 = arith.constant 0 : i32
    %c0_i32_1 = arith.constant 0 : i32
    return %c0_i32, %c0_i32_0 : i32, i32
  }
  func.func @transform_7(%arg0: i32) -> (i32, i32) {
    %c0_i32 = arith.constant 0 : i32
    %c0_i32_0 = arith.constant 0 : i32
    %c0_i32_1 = arith.constant 0 : i32
    return %c0_i32, %c0_i32_0 : i32, i32
  }
  func.func @transform_8(%arg0: i32) -> i32 {
    %c0_i32 = arith.constant 0 : i32
    %c0_i32_0 = arith.constant 0 : i32
    return %c0_i32 : i32
  }
  func.func @transform_9(%arg0: i32) -> (i32, i32, i32) {
    %c0_i32 = arith.constant 0 : i32
    %c0_i32_0 = arith.constant 0 : i32
    %c0_i32_1 = arith.constant 0 : i32
    return %arg0, %c0_i32, %c0_i32_0 : i32, i32, i32
  }
}

</mosaic_0001>

<bundles_post_ra>
// kernel: tpu_custom_call.1
= control target key start
LH: loop header
LB: loop body
LE: loop exit
PB: predicated region body
PF: predicated region fallthrough
CT: control target
= control target key end

     0   :  { %14 = vsyncpa [#allocation4], 0  ;;  %s1963_s0 = inlined_call_operand.vmem [shape: f32[2,32,32], index: 0, kind: input, shape index: {}]   ;;  %s1964_s1 = inlined_call_operand.vmem [shape: f32[2,32,1], index: 1, kind: input, shape index: {}]   ;;  %s1965_s2 = inlined_call_operand.vmem [shape: f32[96,32], index: 2, kind: input, shape index: {}]   ;;  %s1966_s3 = inlined_call_operand.vmem [shape: f32[1,32], index: 3, kind: input, shape index: {}]   ;;  %s1967_s4 = inlined_call_operand.vmem [shape: f32[96,32], index: 4, kind: input, shape index: {}]   ;;  %s1968_s5 = inlined_call_operand.vmem [shape: f32[1,32], index: 5, kind: input, shape index: {}]   ;;  %s1969_s6 = inlined_call_operand.vmem [shape: f32[96,128], index: 6, kind: input, shape index: {}]   ;;  %s1970_s7 = inlined_call_operand.vmem [shape: f32[1,128], index: 7, kind: input, shape index: {}]   ;;  %s1971_s8 = inlined_call_operand.vmem [shape: f32[2], index: 8, kind: input, shape index: {}]   ;;  %s1972_s9 = inlined_call_operand.hbm [shape: f32[2,32,128], index: 9, kind: output, shape index: {}]  }
   0x1   :  { %15 = vsyncpa [#allocation3], 0 }
   0x2   :  { %17 = vsyncpa [#allocation3 + $0x1], 0  ;;  %s1546_s30 = smov 0   ;;  %s1548_s10 = smov 0  }
   0x3   :  { %s1550_s11 = smov 0   ;;  %s1552_s12 = smov 0  }
   0x4 LB: > { %s1567_s13 = sadd.s32 4294967295, %s1486_s12   ;;  %s1149_s14 = sadd.s32 4294967294, %s1486_s12   ;;  %s1486_s12 = sphi %s1552_s12, %s1981_s12   ;;  %s1482_s11 = sphi %s1550_s11, %s1980_s11   ;;  %s1478_s10 = sphi %s1548_s10, %s1979_s10   ;;  %s1474_s30 = sphi %s1546_s30, %s1978_s30  }
   0x5   : > { %s1571_s15 = sadd.s32 1, %s1486_s12   ;;  %s229_s16 = sadd.s32 1, %s1482_s11 }
   0x6   : > { %s226_s17 = ssub.s32 %s1486_s12, %s1571_s15  ;;  %p239_p0 = scmp.ne.s32.totalorder %s1482_s11, %s1478_s10 }
   0x7   : > { %p227_p1 = scmp.eq.s32.totalorder %s226_s17, 0  ;;  %p240_p2 = scmp.eq.s32.totalorder %s1567_s13, 1 }
   0x8   : > { %p245_p3 = scmp.ne.s32.totalorder %s1478_s10, %s1474_s30  ;;  %p246_p4 = scmp.eq.s32.totalorder %s1149_s14, 1 }
   0x9   : > { %s1582_s18 = scalar_select %p227_p1, %s1482_s11, %s229_s16  }
   0xa   : > { %p1584_p5 = por %p240_p2, %p239_p0  ;;  %p1588_p6 = por %p246_p4, %p245_p3 }
   0xb   : > { %p1150_p7 = scmp.ge.s32.totalorder %s1486_s12, 1  ;;  %p253_p8 = scmp.lt.s32.totalorder %s1486_s12, 3 }
   0xc   : > { %p1363_p9 = scmp.eq.s32.totalorder %s1567_s13, 0  ;;  %s284_s24 = sshll.u32 %s1971_s8, 4  ;;  %s285_s24 = int_to_ptr.vmem [resolvable:$true] %s284_s24 }
   0xd   : > { %p1595_p10 = pnand %p1150_p7, %p253_p8  ;;  %s1407_s25 = scalar_lea.vmem %s285_s24, 16 }
   0xe   : > { %p1408_p13 = scmp.ne.s32.totalorder %s285_s24, %s1407_s25  ;;  %p1415_p3 = scmp.lt.s32.totalorder %s285_s24, %s285_s24 }
   0xf   : > { %p1355_p11 = pneg %p1595_p10  ;;  %p1416_p4 = scmp.lt.s32.totalorder %s1407_s25, %s1407_s25 }
  0x11   : > { %p1356_p12 = pnand %p1363_p9, %p1355_p11  ;;  %p1417_p7 = por %p1416_p4, %p1415_p3 }
  0x13   : > { %p1409_p0 = pneg %p1356_p12 }
  0x15   : > { %p1410_p1 = pnand %p1409_p0, %p1408_p13 }
  0x17   : > { %p1411_p2 = pneg %p1410_p1 }
  0x19   : > { %p1418_p8 = pnand %p1417_p7, %p1411_p2 }
  0x1b   : > { %1421 = shalt.err (!%p1418_p8)
}
  0x1c   : > { %s1488_s26 = smov [#allocation2]   ;;  %313 = sbr.rel (%p1595_p10) target bundleno = 1042 (0x412), region = 56 }
  0x1d   : > { %1358 = dma.vmem_to_smem (!%p1356_p12), %s285_s24, 16, %s1488_s26, [#allocation4]  }
  0x21   : > { %1465 = dma.done.wait (%p1363_p9), [#allocation4], 16  }
  0x22   : > { %1467 = vsyncadd (%p1363_p9), [#allocation4], 4294967280 }
  0x23   : > { %319 = sfence }
  0x24   : > { %p355_p11 = scmp.lt.s32.totalorder %s1567_s13, 1  ;;  %v373_v0 = vlaneseq  ;;  %v529_v1 = vld [vmem:[%s1965_s2 + $0x58] sm:$0xff]  ;;  %v528_v2 = vld [vmem:[%s1965_s2 + $0x50] sm:$0xff]  ;;  %v527_v4 = vld [vmem:[%s1965_s2 + $0x48] sm:$0xff]  ;;  %s1489_s28 = smov 32   ;;  %v1490_v27 = vmov 0.0  }
  0x25   : > { %1235 = vmatprep.subr.mxu0 %v529_v1  ;;  %v526_v7 = vld [vmem:[%s1965_s2 + $0x40] sm:$0xff]  ;;  %v525_v20 = vld [vmem:[%s1965_s2 + $0x38] sm:$0xff]  ;;  %v524_v30 = vld [vmem:[%s1965_s2 + $0x30] sm:$0xff]  ;;  %s1491_s23 = smov 64   ;;  %v1492_v41 = vmov 0   ;;  %vm508_vm6 = vcmask 261120  }
  0x26   : > { %s1620_s16 = scalar_select %p355_p11, %s1567_s13, 1  ;;  %v1622_v3 = vshrl.u32 %v373_v0, 7  ;;  %1236 = vmatpush3.msra.mxu0 %v529_v1  ;;  %v523_v39 = vld [vmem:[%s1965_s2 + $0x28] sm:$0xff]  ;;  %1406 = vset.pattern.permute.xlu1 %v1492_v41  ;;  %v522_v43 = vld [vmem:[%s1965_s2 + $0x20] sm:$0xff]  ;;  %v521_v46 = vld [vmem:[%s1965_s2 + $0x18] sm:$0xff]  ;;  %vm513_vm7 = vcmask 523264  }
  0x27   : > { %1237 = vmatprep.subr.mxu0 %v528_v2  ;;  %1405 = vset.pattern.permute.xlu0 %v1492_v41  ;;  %v520_v47 = vld [vmem:[%s1965_s2 + $0x10] sm:$0xff]  ;;  %v519_v50 = vld [vmem:[%s1965_s2 + $0x8] sm:$0xff]  ;;  %v518_v51 = vld [vmem:[%s1965_s2] sm:$0xff]  ;;  %vm537_vm8 = vcmask 785408   ;;  %s352_s24 = sand.u32 1, %s1478_s10  }
  0x28   : > { %s1184_s22 = sshll.u32 %s1620_s16, 5  ;;  %v375_v5 = vadd.s32 8, %v1622_v3  ;;  %v377_v6 = vadd.s32 24, %v1622_v3  ;;  %1238 = vmatpush3.msra.mxu0 %v528_v2  ;;  %vm467_vm0 = vcmp.lt.s32.totalorder %v1622_v3, 7  ;;  %v382_v8 = vand.u32 15, %v1622_v3 }
  0x29   : > { %s359_s25 = scalar_lea.vmem %s1963_s0, %s1184_s22  ;;  %1239 = vmatprep.subr.mxu0 %v527_v4  ;;  %v376_v14 = vadd.s32 16, %v1622_v3  ;;  %vm454_vm3 = vcmp.lt.s32.totalorder %v1622_v3, 1  ;;  %s364_s17 = scalar_lea.vmem %s1964_s1, %s1184_s22 }
  0x2a   : > { %v368_v9 = vld [vmem:[%s359_s25 + $0x18] sm:$0xff]  ;;  %v365_v10 = vld [vmem:[%s359_s25] sm:$0xff]  ;;  %v366_v11 = vld [vmem:[%s359_s25 + $0x8] sm:$0xff]  ;;  %v389_v12 = vand.u32 15, %v375_v5  ;;  %v403_v13 = vand.u32 15, %v377_v6  ;;  %1240 = vmatpush3.msra.mxu0 %v527_v4  ;;  %vm426_vm4 = vcmp.gt.s32.totalorder %v382_v8, 0 }
  0x2b   : > { %486 = vrot.lane.b32.xlu1 %v368_v9, %s1489_s28  ;;  %v453_v15 = vrot.slane %v368_v9, 7  ;;  %v466_v16 = vrot.slane %v368_v9, 1  ;;  %480 = vrot.lane.b32.xlu0 %v365_v10, %s1489_s28  ;;  %v450_v17 = vrot.slane %v365_v10, 7  ;;  %v463_v18 = vrot.slane %v365_v10, 1  ;;  %v367_v19 = vld [vmem:[%s359_s25 + $0x10] sm:$0xff]  ;;  %v370_v49 = vld [vmem:[%s364_s17 + $0x8] sm:$0xff] }
  0x2c   : > { %v451_v21 = vrot.slane %v366_v11, 7  ;;  %v464_v22 = vrot.slane %v366_v11, 1  ;;  %v452_v23 = vrot.slane %v367_v19, 7  ;;  %v465_v24 = vrot.slane %v367_v19, 1  ;;  %1241 = vmatprep.subr.mxu0 %v526_v7  ;;  %v371_v48 = vld [vmem:[%s364_s17 + $0x10] sm:$0xff]  ;;  %v369_v52 = vld [vmem:[%s364_s17] sm:$0xff] }
  0x2d   : > { %vm439_vm1 = vcmp.lt.s32.totalorder %v389_v12, 15  ;;  %vm1646_vm2 = vcmp.lt.s32.totalorder %v403_v13, 15  ;;  %1242 = vmatpush3.msra.mxu0 %v526_v7  ;;  %v471_v32 = vsel %vm467_vm0, %v466_v16, %v463_v18  ;;  %v1669_v34 = vsel %vm426_vm4, 1.0, %v1490_v27  ;;  %v372_v53 = vld [vmem:[%s364_s17 + $0x18] sm:$0xff]  ;;  %v737_v10 = vld [vmem:[%s1967_s4 + $0x50] sm:$0xff]  ;;  %v735_v12 = vld [vmem:[%s1967_s4 + $0x40] sm:$0xff] }
  0x2e   : > { %v470_v26 = vsel %vm467_vm0, %v463_v18, %v464_v22  ;;  %v1653_v28 = vsel %vm439_vm1, 1.0, %v1490_v27  ;;  %v469_v29 = vsel %vm467_vm0, %v464_v22, %v465_v24  ;;  %1243 = vmatprep.subr.mxu0 %v525_v20  ;;  %v1667_v33 = vsel %vm454_vm3, %v452_v23, %v453_v15  ;;  %v738_v9 = vld [vmem:[%s1967_s4 + $0x58] sm:$0xff]  ;;  %v1164_v18 = vld [vmem:[%s1966_s3] ss:$0 sm:$0xff]  ;;  %s1155_s25 = sshll.u32 %s352_s24, 5  ;;  %s1186_s22 = sshll.u32 %s1567_s13, 9 }
  0x2f   : > { %482 = vrot.lane.b32.xlu0 %v366_v11, %s1489_s28  ;;  %496 = vrot.lane.b32.xlu1 %v470_v26, %s1491_s23  ;;  %v473_v31 = vmul.f32 %v1653_v28, %v469_v29  ;;  %v1673_v35 = vsel %vm1646_vm2, 1.0, %v1490_v27  ;;  %v458_v36 = vsel %vm454_vm3, %v453_v15, %v450_v17  ;;  %v457_v37 = vsel %vm454_vm3, %v450_v17, %v451_v21  ;;  %v736_v11 = vld [vmem:[%s1967_s4 + $0x48] sm:$0xff]  ;;  %v734_v13 = vld [vmem:[%s1967_s4 + $0x38] sm:$0xff]  ;;  %s354_s26 = scalar_lea.vmem [#allocation5], %s1155_s25  ;;  %s1917_s14 = scalar_lea.hbm %s1972_s9, %s1186_s22 }
  0x30   : > { %1244 = vmatpush3.msra.mxu0 %v525_v20  ;;  %v396_v38 = vand.u32 15, %v376_v14  ;;  %v456_v40 = vsel %vm454_vm3, %v451_v21, %v452_v23  ;;  %v475_v42 = vmul.f32 %v1673_v35, %v471_v32  ;;  %v468_v45 = vsel %vm467_vm0, %v465_v24, %v466_v16  ;;  %1265 = vmatprep.subr.mxu1 %v738_v9  ;;  %v733_v14 = vld [vmem:[%s1967_s4 + $0x30] sm:$0xff]  ;;  %v732_v15 = vld [vmem:[%s1967_s4 + $0x28] sm:$0xff]  ;;  %v731_v16 = vld [vmem:[%s1967_s4 + $0x20] sm:$0xff]  ;;  %s1063_s16 = sshll.u32 %s354_s26, 4  ;;  %s1923_s17 = scalar_lea.sflag [#allocation3], %s352_s24  ;;  %s1919_s16 = int_to_ptr.vmem [resolvable:$true] %s1063_s16 }
  0x31   : > { %1245 = vmatprep.subr.mxu0 %v524_v30  ;;  %v459_v56 = vmul.f32 %v1669_v34, %v458_v36  ;;  %1266 = vmatpush3.msra.mxu1 %v738_v9  ;;  %v729_v21 = vld [vmem:[%s1967_s4 + $0x10] sm:$0xff]  ;;  %v728_v24 = vld [vmem:[%s1967_s4 + $0x8] sm:$0xff] }
  0x32   : > { %1246 = vmatpush3.msra.mxu0 %v524_v30  ;;  %vm428_vm5 = vcmp.gt.s32.totalorder %v396_v38, 0  ;;  %1267 = vmatprep.subr.mxu1 %v737_v10  ;;  %v727_v30 = vld [vmem:[%s1967_s4] sm:$0xff] }
  0x33   : > { %484 = vrot.lane.b32.xlu0 %v367_v19, %s1489_s28  ;;  %498 = vrot.lane.b32.xlu1 %v473_v31, %s1491_s23  ;;  %v1690_v44 = vsel %vm428_vm5, 1.0, %v1490_v27  ;;  %v730_v19 = vld [vmem:[%s1967_s4 + $0x18] sm:$0xff] }
  0x34   : > { %1247 = vmatprep.subr.mxu0 %v523_v39  ;;  %v461_v62 = vmul.f32 %v1690_v44, %v456_v40  ;;  %1268 = vmatpush3.msra.mxu1 %v737_v10 }
  0x35   : > { %1248 = vmatpush3.msra.mxu0 %v523_v39  ;;  %1269 = vmatprep.subr.mxu1 %v736_v11 }
  0x36   : > { %1249 = vmatprep.subr.mxu0 %v522_v43  ;;  %1270 = vmatpush3.msra.mxu1 %v736_v11 }
  0x37   : > { %500 = vrot.lane.b32.xlu0 %v468_v45, %s1491_s23  ;;  %502 = vrot.lane.b32.xlu1 %v475_v42, %s1491_s23 }
  0x38   : > { %1250 = vmatpush3.msra.mxu0 %v522_v43  ;;  %1271 = vmatprep.subr.mxu1 %v735_v12 }
  0x39   : > { %1251 = vmatprep.subr.mxu0 %v521_v46  ;;  %1272 = vmatpush3.msra.mxu1 %v735_v12 }
  0x3a   : > { %1252 = vmatpush3.msra.mxu0 %v521_v46  ;;  %1273 = vmatprep.subr.mxu1 %v734_v13 }
  0x3b   : > { %1253 = vmatprep.subr.mxu0 %v520_v47  ;;  %647 = vperm.xlu1 %1406, %v371_v48  }
  0x3c   : > { %1254 = vmatpush3.msra.mxu0 %v520_v47  ;;  %642 = vperm.xlu0 %1405, %v370_v49  }
  0x3d   : > { %1255 = vmatprep.subr.mxu0 %v519_v50  ;;  %1274 = vmatpush3.msra.mxu1 %v734_v13 }
  0x3e   : > { %1256 = vmatpush3.msra.mxu0 %v519_v50  ;;  %1275 = vmatprep.subr.mxu1 %v733_v14 }
  0x3f   : > { %1257 = vmatprep.subr.mxu0 %v518_v51  ;;  %637 = vperm.xlu1 %1406, %v369_v52  }
  0x40   : > { %1258 = vmatpush3.msra.mxu0 %v518_v51  ;;  %652 = vperm.xlu0 %1405, %v372_v53  }
  0x41   : > { %1276 = vmatpush3.msra.mxu1 %v733_v14 }
  0x42   : > { %1277 = vmatprep.subr.mxu1 %v732_v15 }
  0x43   : > { %1278 = vmatpush3.msra.mxu1 %v732_v15 }
  0x44   : > { %1279 = vmatprep.subr.mxu1 %v731_v16 }
  0x45   : > { %1280 = vmatpush3.msra.mxu1 %v731_v16 }
  0x46   : > { %1281 = vmatprep.subr.mxu1 %v730_v19 }
  0x47   : > { %1282 = vmatpush3.msra.mxu1 %v730_v19 }
  0x48   : > { %1283 = vmatprep.subr.mxu1 %v729_v21 }
  0x49   : > { %1284 = vmatpush3.msra.mxu1 %v729_v21  ;;  %v926_v21 = vld [vmem:[%s1969_s6 + $0x58] sm:$0xff] }
  0x4a   : > { %1285 = vmatprep.subr.mxu1 %v728_v24  ;;  %1295 = vmatprep.subr.mxu0 %v926_v21 }
  0x4b   : > { %1286 = vmatpush3.msra.mxu1 %v728_v24  ;;  %v923_v24 = vld [vmem:[%s1969_s6 + $0x40] sm:$0xff] }
  0x4c   : > { %1287 = vmatprep.subr.mxu1 %v727_v30 }
  0x4d   : > { %1288 = vmatpush3.msra.mxu1 %v727_v30  ;;  %v919_v30 = vld [vmem:[%s1969_s6 + $0x20] sm:$0xff] }
  0x4e   : > { %1325 = vmatprep.subr.mxu1 %v926_v21 }
  0x9d   : > { %v487_v54 = vpop.permute.xlu1 %486  ;;  %v481_v55 = vpop.permute.xlu0 %480 }
  0x9e   : > { %v509_v57 = vsel %vm508_vm6, %v459_v56, %v481_v55  ;;  %v512_v2 = vsel %vm508_vm6, %v1667_v33, %v487_v54 }
  0xa1   : > { %v483_v58 = vpop.permute.xlu0 %482  ;;  %v497_v59 = vpop.permute.xlu1 %496 }
  0xa2   : > { %v514_v60 = vsel %vm513_vm7, %v509_v57, %v497_v59  ;;  %v510_v61 = vsel %vm508_vm6, %v457_v37, %v483_v58 }
  0xa3   : > { %1259 = vmatprep.mubr.msk.f32.mxu0 %vm537_vm8, %v514_v60 }
  0xa5   : > { %v485_v63 = vpop.permute.xlu0 %484  ;;  %v499_v0 = vpop.permute.xlu1 %498 }
  0xa6   : > { %v515_v1 = vsel %vm513_vm7, %v510_v61, %v499_v0  ;;  %v511_v4 = vsel %vm508_vm6, %v461_v62, %v485_v63 }
  0xa7   : > { %1260 = vmatmul.mubr.msk.f32.vlgmr.msra.gmra.mxu0 %vm537_vm8, %v515_v1 }
  0xa8   : > { %1296 = vmatpush3.msra.mxu0 %v926_v21 }
  0xa9   : > { %v501_v5 = vpop.permute.xlu0 %500  ;;  %v503_v6 = vpop.permute.xlu1 %502 }
  0xaa   : > { %v516_v7 = vsel %vm513_vm7, %v511_v4, %v501_v5  ;;  %v517_v8 = vsel %vm513_vm7, %v512_v2, %v503_v6 }
  0xab   : > { %1262 = vmatprep.mubr.msk.f32.mxu0 %vm537_vm8, %v516_v7 }
  0xac   : > { %1263 = vmatmul.mubr.msk.f32.gmra.mxu0 %vm537_vm8, %v517_v8 }
  0xb6   : > { %v1752_v17 = vpop.permute.xlu1 %647 }
  0xb7   : > { %v1760_v20 = vpop.permute.xlu0 %642 }
  0xba   : > { %v1769_v29 = vpop.permute.xlu1 %637 }
  0xbb   : > { %v1775_v33 = vpop.permute.xlu0 %652 }
 0x167   : > { %v1261_v22 = vpop.f32.mrf.mxu0 }
 0x168   : > { %v622_v23 = vadd.f32 %v1261_v22, %v1164_v18  ;;  %v925_v22 = vld [vmem:[%s1969_s6 + $0x50] sm:$0xff] }
 0x169   : > { %v616_v25 = vpop.f32.mrf.mxu0  ;;  %1297 = vmatprep.subr.mxu0 %v925_v22 }
 0x16a   : > { %v656_v26 = vmul.f32 %v1760_v20, %v622_v23  ;;  %v617_v27 = vadd.f32 %v1164_v18, %v616_v25  ;;  %v924_v23 = vld [vmem:[%s1969_s6 + $0x48] sm:$0xff]  ;;  %1298 = vmatpush3.msra.mxu0 %v925_v22  ;;  %v922_v25 = vld [vmem:[%s1969_s6 + $0x38] sm:$0xff] }
 0x16b   : > { %1299 = vmatprep.subr.mxu0 %v924_v23 }
 0x16c   : > { %v655_v31 = vmul.f32 %v1769_v29, %v617_v27  ;;  %v1264_v32 = vpop.f32.mrf.mxu0  ;;  %v660_v36 = vmax.f32 %v656_v26, 0.0  ;;  %1300 = vmatpush3.msra.mxu0 %v924_v23  ;;  %v921_v26 = vld [vmem:[%s1969_s6 + $0x30] sm:$0xff]  ;;  %v920_v27 = vld [vmem:[%s1969_s6 + $0x28] sm:$0xff] }
 0x16d   : > { %v632_v37 = vadd.f32 %v1264_v32, %v1164_v18  ;;  %1301 = vmatprep.subr.mxu0 %v923_v24  ;;  %v918_v32 = vld [vmem:[%s1969_s6 + $0x18] sm:$0xff] }
 0x16e   : > { %v659_v38 = vmax.f32 %v655_v31, 0.0  ;;  %693 = vrot.lane.b32.xlu0 %v660_v36, %s1489_s28  ;;  %v626_v39 = vpop.f32.mrf.mxu0  ;;  %v676_v45 = vrot.slane %v660_v36, 1  ;;  %v664_v46 = vrot.slane %v660_v36, 7  ;;  %1302 = vmatpush3.msra.mxu0 %v923_v24  ;;  %v1169_v31 = vld [vmem:[%s1968_s5] ss:$0 sm:$0xff]  ;;  %v917_v36 = vld [vmem:[%s1969_s6 + $0x10] sm:$0xff] }
 0x16f   : > { %v658_v40 = vmul.f32 %v1775_v33, %v632_v37  ;;  %v627_v41 = vadd.f32 %v1164_v18, %v626_v39  ;;  %1303 = vmatprep.subr.mxu0 %v922_v25 }
 0x170   : > { %v663_v42 = vrot.slane %v659_v38, 7  ;;  %691 = vrot.lane.b32.xlu1 %v659_v38, %s1489_s28  ;;  %v675_v43 = vrot.slane %v659_v38, 1  ;;  %1304 = vmatpush3.msra.mxu0 %v922_v25 }
 0x171   : > { %v657_v47 = vmul.f32 %v1752_v17, %v627_v41  ;;  %v662_v48 = vmax.f32 %v658_v40, 0.0  ;;  %1305 = vmatprep.subr.mxu0 %v921_v26  ;;  %v916_v40 = vld [vmem:[%s1969_s6 + $0x8] sm:$0xff] }
 0x172   : > { %v681_v49 = vsel %vm467_vm0, %v675_v43, %v676_v45  ;;  %v669_v50 = vsel %vm454_vm3, %v663_v42, %v664_v46  ;;  %1306 = vmatpush3.msra.mxu0 %v921_v26 }
 0x173   : > { %v661_v51 = vmax.f32 %v657_v47, 0.0  ;;  %697 = vrot.lane.b32.xlu0 %v662_v48, %s1489_s28  ;;  %v666_v52 = vrot.slane %v662_v48, 7  ;;  %v678_v55 = vrot.slane %v662_v48, 1  ;;  %1307 = vmatprep.subr.mxu0 %v920_v27 }
 0x174   : > { %707 = vrot.lane.b32.xlu1 %v681_v49, %s1491_s23  ;;  %1308 = vmatpush3.msra.mxu0 %v920_v27 }
 0x175   : > { %v665_v53 = vrot.slane %v661_v51, 7  ;;  %v677_v54 = vrot.slane %v661_v51, 1  ;;  %v670_v56 = vsel %vm454_vm3, %v666_v52, %v663_v42  ;;  %v682_v61 = vsel %vm467_vm0, %v678_v55, %v675_v43  ;;  %1309 = vmatprep.subr.mxu0 %v919_v30  ;;  %v915_v43 = vld [vmem:[%s1969_s6] sm:$0xff] }
 0x176   : > { %v686_v63 = vmul.f32 %v1673_v35, %v682_v61  ;;  %v671_v2 = vmul.f32 %v1669_v34, %v670_v56  ;;  %1310 = vmatpush3.msra.mxu0 %v919_v30 }
 0x177   : > { %v680_v57 = vsel %vm467_vm0, %v676_v45, %v677_v54  ;;  %v667_v58 = vsel %vm454_vm3, %v665_v53, %v666_v52  ;;  %v668_v59 = vsel %vm454_vm3, %v664_v46, %v665_v53  ;;  %v679_v62 = vsel %vm467_vm0, %v677_v54, %v678_v55  ;;  %1311 = vmatprep.subr.mxu0 %v918_v32 }
 0x178   : > { %695 = vrot.lane.b32.xlu1 %v661_v51, %s1489_s28  ;;  %v684_v60 = vmul.f32 %v1653_v28, %v680_v57  ;;  %v673_v10 = vmul.f32 %v1690_v44, %v668_v59  ;;  %1312 = vmatpush3.msra.mxu0 %v918_v32 }
 0x179   : > { %1313 = vmatprep.subr.mxu0 %v917_v36 }
 0x17a   : > { %709 = vrot.lane.b32.xlu0 %v684_v60, %s1491_s23  ;;  %1314 = vmatpush3.msra.mxu0 %v917_v36 }
 0x17b   : > { %1315 = vmatprep.subr.mxu0 %v916_v40 }
 0x17c   : > { %711 = vrot.lane.b32.xlu1 %v679_v62, %s1491_s23  ;;  %1316 = vmatpush3.msra.mxu0 %v916_v40 }
 0x17d   : > { %1317 = vmatprep.subr.mxu0 %v915_v43 }
 0x17e   : > { %713 = vrot.lane.b32.xlu0 %v686_v63, %s1491_s23  ;;  %1318 = vmatpush3.msra.mxu0 %v915_v43 }
 0x1e0   : > { %v694_v0 = vpop.permute.xlu0 %693 }
 0x1e1   : > { %v720_v9 = vsel %vm508_vm6, %v669_v50, %v694_v0 }
 0x1e2   : > { %v692_v1 = vpop.permute.xlu1 %691 }
 0x1e3   : > { %v719_v4 = vsel %vm508_vm6, %v671_v2, %v692_v1 }
 0x1e5   : > { %v698_v7 = vpop.permute.xlu0 %697 }
 0x1e6   : > { %v708_v5 = vpop.permute.xlu1 %707  ;;  %v722_v16 = vsel %vm508_vm6, %v667_v58, %v698_v7 }
 0x1e7   : > { %v723_v6 = vsel %vm513_vm7, %v719_v4, %v708_v5 }
 0x1e8   : > { %1289 = vmatprep.mubr.msk.f32.mxu1 %vm537_vm8, %v723_v6 }
 0x1ea   : > { %v696_v8 = vpop.permute.xlu1 %695 }
 0x1eb   : > { %v721_v13 = vsel %vm508_vm6, %v673_v10, %v696_v8 }
 0x1ec   : > { %v710_v11 = vpop.permute.xlu0 %709 }
 0x1ed   : > { %v724_v12 = vsel %vm513_vm7, %v720_v9, %v710_v11 }
 0x1ee   : > { %v712_v14 = vpop.permute.xlu1 %711  ;;  %1290 = vmatmul.mubr.msk.f32.vlgmr.msra.gmra.mxu1 %vm537_vm8, %v724_v12 }
 0x1ef   : > { %v725_v15 = vsel %vm513_vm7, %v721_v13, %v712_v14  ;;  %1337 = vmatpush3.msra.mxu1 %v926_v21 }
 0x1f0   : > { %v714_v18 = vpop.permute.xlu0 %713  ;;  %1292 = vmatprep.mubr.msk.f32.mxu1 %vm537_vm8, %v725_v15  ;;  %1326 = vmatprep.subr.mxu1 %v925_v22 }
 0x1f1   : > { %v726_v19 = vsel %vm513_vm7, %v722_v16, %v714_v18  ;;  %1338 = vmatpush3.msra.mxu1 %v925_v22 }
 0x1f2   : > { %1293 = vmatmul.mubr.msk.f32.gmra.mxu1 %vm537_vm8, %v726_v19  ;;  %1327 = vmatprep.subr.mxu1 %v924_v23 }
 0x1f3   : > { %1339 = vmatpush3.msra.mxu1 %v924_v23 }
 0x1f4   : > { %1328 = vmatprep.subr.mxu1 %v923_v24 }
 0x1f5   : > { %1340 = vmatpush3.msra.mxu1 %v923_v24 }
 0x1f6   : > { %1329 = vmatprep.subr.mxu1 %v922_v25 }
 0x1f7   : > { %1341 = vmatpush3.msra.mxu1 %v922_v25 }
 0x1f8   : > { %1330 = vmatprep.subr.mxu1 %v921_v26 }
 0x1f9   : > { %1342 = vmatpush3.msra.mxu1 %v921_v26  ;;  %v1174_v26 = vld [vmem:[%s1970_s7] ss:$0 sm:$0xff] }
 0x1fa   : > { %1331 = vmatprep.subr.mxu1 %v920_v27 }
 0x1fb   : > { %1343 = vmatpush3.msra.mxu1 %v920_v27 }
 0x1fc   : > { %1332 = vmatprep.subr.mxu1 %v919_v30 }
 0x1fd   : > { %1344 = vmatpush3.msra.mxu1 %v919_v30 }
 0x1fe   : > { %1333 = vmatprep.subr.mxu1 %v918_v32 }
 0x1ff   : > { %1345 = vmatpush3.msra.mxu1 %v918_v32 }
 0x200   : > { %1334 = vmatprep.subr.mxu1 %v917_v36 }
 0x201   : > { %1346 = vmatpush3.msra.mxu1 %v917_v36 }
 0x202   : > { %1335 = vmatprep.subr.mxu1 %v916_v40 }
 0x203   : > { %1347 = vmatpush3.msra.mxu1 %v916_v40 }
 0x204   : > { %1336 = vmatprep.subr.mxu1 %v915_v43 }
 0x205   : > { %1348 = vmatpush3.msra.mxu1 %v915_v43 }
 0x2ae   : > { %v1291_v37 = vpop.f32.mrf.mxu1 }
 0x2af   : > { %v830_v38 = vadd.f32 %v1291_v37, %v1169_v31 }
 0x2b0   : > { %v824_v39 = vpop.f32.mrf.mxu1 }
 0x2b1   : > { %v844_v41 = vmul.f32 %v830_v38, %v1760_v20  ;;  %v825_v42 = vadd.f32 %v1169_v31, %v824_v39 }
 0x2b2   : > { %v1294_v45 = vpop.f32.mrf.mxu1 }
 0x2b3   : > { %v848_v46 = vmax.f32 %v844_v41, 0.0  ;;  %v843_v47 = vmul.f32 %v825_v42, %v1769_v29  ;;  %v840_v48 = vadd.f32 %v1294_v45, %v1169_v31 }
 0x2b4   : > { %v834_v49 = vpop.f32.mrf.mxu1 }
 0x2b5   : > { %v847_v50 = vmax.f32 %v843_v47, 0.0  ;;  %v846_v51 = vmul.f32 %v840_v48, %v1775_v33  ;;  %v835_v52 = vadd.f32 %v1169_v31, %v834_v49  ;;  %881 = vrot.lane.b32.xlu1 %v848_v46, %s1489_s28  ;;  %v852_v56 = vrot.slane %v848_v46, 7 }
 0x2b6   : > { %v864_v60 = vrot.slane %v848_v46, 1 }
 0x2b7   : > { %v851_v53 = vrot.slane %v847_v50, 7  ;;  %v850_v54 = vmax.f32 %v846_v51, 0.0  ;;  %v845_v55 = vmul.f32 %v835_v52, %v1752_v17  ;;  %v863_v57 = vrot.slane %v847_v50, 1 }
 0x2b9   : > { %v854_v58 = vrot.slane %v850_v54, 7  ;;  %v849_v59 = vmax.f32 %v845_v55, 0.0  ;;  %885 = vrot.lane.b32.xlu0 %v850_v54, %s1489_s28  ;;  %879 = vrot.lane.b32.xlu1 %v847_v50, %s1489_s28  ;;  %v857_v61 = vsel %vm454_vm3, %v851_v53, %v852_v56  ;;  %v869_v1 = vsel %vm467_vm0, %v863_v57, %v864_v60 }
 0x2ba   : > { %v866_v2 = vrot.slane %v850_v54, 1 }
 0x2bb   : > { %v853_v62 = vrot.slane %v849_v59, 7  ;;  %v865_v63 = vrot.slane %v849_v59, 1  ;;  %v858_v0 = vsel %vm454_vm3, %v854_v58, %v851_v53 }
 0x2bc   : > { %v870_v9 = vsel %vm467_vm0, %v866_v2, %v863_v57  ;;  %v859_v13 = vmul.f32 %v1669_v34, %v858_v0 }
 0x2bd   : > { %883 = vrot.lane.b32.xlu0 %v849_v59, %s1489_s28  ;;  %895 = vrot.lane.b32.xlu1 %v869_v1, %s1491_s23  ;;  %v868_v4 = vsel %vm467_vm0, %v864_v60, %v865_v63  ;;  %v855_v5 = vsel %vm454_vm3, %v853_v62, %v854_v58  ;;  %v856_v7 = vsel %vm454_vm3, %v852_v56, %v853_v62  ;;  %s1035_s28 = sld [smem:[#allocation2 + %s1567_s13]]  ;;  %s1422_s13 = scalar_lea.vmem %s1919_s16, 512 }
 0x2be   : > { %v872_v6 = vmul.f32 %v1653_v28, %v868_v4  ;;  %v867_v8 = vsel %vm467_vm0, %v865_v63, %v866_v2  ;;  %v874_v10 = vmul.f32 %v1673_v35, %v870_v9  ;;  %v861_v18 = vmul.f32 %v1690_v44, %v856_v7  ;;  %p1423_p9 = scmp.ne.s32.totalorder %s1919_s16, %s1422_s13 }
 0x2c0   : > { %p1424_p10 = pnand %p1423_p9, %p1584_p5 }
 0x2c1   : > { %899 = vrot.lane.b32.xlu0 %v867_v8, %s1491_s23  ;;  %897 = vrot.lane.b32.xlu1 %v872_v6, %s1491_s23 }
 0x2c2   : > { %p1425_p12 = pneg %p1424_p10 }
 0x2c3   : > { %v1036_v31 = vstv %s1035_s28  ;;  %s1493_s28 = smov [#allocation5]  }
 0x2c5   : > { %901 = vrot.lane.b32.xlu0 %v874_v10, %s1491_s23  ;;  %s1426_s23 = sshll.u32 %s1493_s28, 4  ;;  %s1427_s23 = int_to_ptr.vmem [resolvable:$false] %s1426_s23 }
 0x2c6   : > { %s1428_s21 = scalar_lea.vmem %s1427_s23, 1024  ;;  %p1429_p13 = scmp.lt.s32.totalorder %s1919_s16, %s1427_s23 }
 0x2c7   : > { %p1430_p0 = scmp.lt.s32.totalorder %s1428_s21, %s1422_s13 }
 0x2c9   : > { %p1431_p1 = por %p1430_p0, %p1429_p13 }
 0x2cb   : > { %p1432_p2 = pnand %p1431_p1, %p1425_p12 }
 0x327   : > { %v882_v11 = vpop.permute.xlu1 %881 }
 0x328   : > { %v908_v35 = vsel %vm508_vm6, %v857_v61, %v882_v11 }
 0x32b   : > { %v886_v12 = vpop.permute.xlu0 %885  ;;  %v880_v28 = vpop.permute.xlu1 %879 }
 0x32c   : > { %v907_v14 = vsel %vm508_vm6, %v859_v13, %v880_v28  ;;  %v910_v44 = vsel %vm508_vm6, %v855_v5, %v886_v12 }
 0x32f   : > { %v884_v15 = vpop.permute.xlu0 %883  ;;  %v896_v16 = vpop.permute.xlu1 %895 }
 0x330   : > { %v911_v3 = vsel %vm513_vm7, %v907_v14, %v896_v16  ;;  %v909_v19 = vsel %vm508_vm6, %v861_v18, %v884_v15 }
 0x331   : > { %1319 = vmatprep.mubr.msk.f32.mxu0 %vm537_vm8, %v911_v3 }
 0x333   : > { %v900_v21 = vpop.permute.xlu0 %899  ;;  %v898_v22 = vpop.permute.xlu1 %897 }
 0x334   : > { %v913_v34 = vsel %vm513_vm7, %v909_v19, %v900_v21  ;;  %v912_v23 = vsel %vm513_vm7, %v908_v35, %v898_v22 }
 0x335   : > { %1320 = vmatmul.mubr.msk.f32.vlgmr.msra.gmra.mxu0 %vm537_vm8, %v912_v23  ;;  %1322 = vmatprep.mubr.msk.f32.mxu1 %vm537_vm8, %v913_v34 }
 0x337   : > { %v902_v24 = vpop.permute.xlu0 %901 }
 0x338   : > { %v914_v25 = vsel %vm513_vm7, %v910_v44, %v902_v24 }
 0x339   : > { %1323 = vmatmul.mubr.msk.f32.vlgmr.msra.gmra.mxu1 %vm537_vm8, %v914_v25 }
 0x3f5   : > { %v1321_v27 = vpop.f32.mrf.mxu0 }
 0x3f6   : > { %v1018_v30 = vadd.f32 %v1321_v27, %v1174_v26 }
 0x3f7   : > { %v1012_v32 = vpop.f32.mrf.mxu0 }
 0x3f8   : > { %v1032_v36 = vmul.f32 %v1018_v30, %v1760_v20  ;;  %v1013_v37 = vadd.f32 %v1174_v26, %v1012_v32 }
 0x3f9   : > { %v1324_v38 = vpop.f32.mrf.mxu1 }
 0x3fa   : > { %v1038_v39 = vmul.f32 %v1036_v31, %v1032_v36  ;;  %v1031_v40 = vmul.f32 %v1013_v37, %v1769_v29  ;;  %v1028_v41 = vadd.f32 %v1324_v38, %v1174_v26 }
 0x3fb   : > { %v1022_v42 = vpop.f32.mrf.mxu1 }
 0x3fc   : > { %v1042_v43 = vmax.f32 %v1038_v39, 0.0  ;;  %v1037_v45 = vmul.f32 %v1036_v31, %v1031_v40  ;;  %v1034_v46 = vmul.f32 %v1028_v41, %v1775_v33  ;;  %v1023_v47 = vadd.f32 %v1174_v26, %v1022_v42 }
 0x3fe   : > { %1046 = vst [vmem:[%s354_s26 + $0x8] sm:$0xff] %v1042_v43  ;;  %v1041_v48 = vmax.f32 %v1037_v45, 0.0  ;;  %v1040_v20 = vmul.f32 %v1036_v31, %v1034_v46  ;;  %v1033_v49 = vmul.f32 %v1023_v47, %v1752_v17 }
 0x400   : > { %1045 = vst [vmem:[%s354_s26] sm:$0xff] %v1041_v48  ;;  %v1044_v50 = vmax.f32 %v1040_v20, 0.0  ;;  %v1039_v29 = vmul.f32 %v1036_v31, %v1033_v49 }
 0x402   : > { %1048 = vst [vmem:[%s354_s26 + $0x18] sm:$0xff] %v1044_v50  ;;  %v1043_v33 = vmax.f32 %v1039_v29, 0.0 }
 0x404   : > { %1047 = vst [vmem:[%s354_s26 + $0x10] sm:$0xff] %v1043_v33 }
 0x405   : > { %1435 = shalt.err (!%p1432_p2)
}
 0x406   : > { %s1436_s24 = scalar_lea.hbm %s1917_s14, 512  ;;  %s1440_s22 = scalar_lea.hbm %s1972_s9, 1024 }
 0x407   : > { %p1437_p3 = scmp.ne.s32.totalorder %s1917_s14, %s1436_s24  ;;  %p1441_p8 = scmp.lt.s32.totalorder %s1917_s14, %s1972_s9 }
 0x408   : > { %p1442_p11 = scmp.lt.s32.totalorder %s1440_s22, %s1436_s24 }
 0x409   : > { %p1438_p4 = pnand %p1437_p3, %p1584_p5 }
 0x40a   : > { %p1443_p9 = por %p1442_p11, %p1441_p8 }
 0x40b   : > { %p1439_p7 = pneg %p1438_p4 }
 0x40d   : > { %p1444_p10 = pnand %p1443_p9, %p1439_p7 }
 0x40f   : > { %1447 = shalt.err (!%p1444_p10)
}
 0x410   : > { %s1494_s13 = smov 128   ;;  %s1495_s28 = smov 8  }
 0x411   : > { %1353 = dma.vmem_to_hbm [thread:$0]  (%p1584_p5), %s1919_s16, 512, %s1917_s14, %s1923_s17, %s1494_s13, %s1494_s13, %s1495_s28  }
 0x412 PF: > { %p1365_p12 = scmp.ge.s32.totalorder %s1486_s12, 2  ;;  %s1078_s23 = sand.u32 1, %s1474_s30  }
 0x413   : > { %s1079_s21 = scalar_lea.sflag [#allocation3], %s1078_s23 }
 0x414   : > { %p1360_p13 = pnand %p1365_p12, %p1588_p6 }
 0x416   : > { %p1361_p0 = pneg %p1360_p13 }
 0x418   : > { %1469 = dma.done.wait (%p1361_p0), %s1079_s21, 512  }
 0x419   : > { %1471 = vsyncadd (%p1361_p0), %s1079_s21, 4294966784  ;;  %p20_p1 = scmp.ge.s32.totalorder %s1571_s15, 4   ;;  %s1978_s30 = smov %s1478_s10 }
 0x41a   : > { %s1979_s10 = smov %s1482_s11  ;;  %s1980_s11 = smov %s1582_s18 }
 0x41b   : > { %s1981_s12 = smov %s1571_s15  ;;  %22 = sbr.rel (!%p20_p1) target bundleno = 4 (0x4), region = 99 }
 0x420   :  { %1084 = vsyncpa [#allocation3], 1 }
 0x421   :  { %1086 = vsyncpa [#allocation3 + $0x1], 1 }
 0x422   :  { %1087 = vsyncpa [#allocation4], 1 }
 0x423   :  { %1089 = vsyncpa [#allocation4 + $0x1], 1 }

</bundles_post_ra>
